<compile_context>
chip_gen: v5e
topology: v5e:2x2
jax: 0.10.0
libtpu: 0.0.40
codegen_flags: <defaults>
</compile_context>

<pallas_src>
import jax
import jax.numpy as jnp
from jax import lax
from jax.experimental import pallas as pl
from jax.experimental.pallas import tpu as pltpu


# Contract last dim of [1, H] against last dim of [S, H] -> [1, S] (a @ b^T).
_SCORE_DN = (((1,), (1,)), ((), ()))


def _softmax_lastdim(x):
    m = jnp.max(x, axis=-1, keepdims=True)
    e = jnp.exp(x - m)
    return e / jnp.sum(e, axis=-1, keepdims=True)


def _dot_kernel(hid_ref, enc_ref, out_ref):
    hid = hid_ref[...]                                      # [1, H]
    enc = enc_ref[...]                                      # [S, H]
    scores = lax.dot_general(hid, enc, _SCORE_DN,
                             preferred_element_type=jnp.float32)   # [1, S]
    out_ref[...] = _softmax_lastdim(scores)


def _general_kernel(hid_ref, enc_ref, w_ref, b_ref, out_ref):
    hid = hid_ref[...]                                      # [1, H]
    enc = enc_ref[...]                                      # [S, H]
    energy = jnp.dot(enc, w_ref[...],
                     preferred_element_type=jnp.float32) + b_ref[...]   # [S, H]
    scores = lax.dot_general(hid, energy, _SCORE_DN,
                             preferred_element_type=jnp.float32)        # [1, S]
    out_ref[...] = _softmax_lastdim(scores)


def _concat_kernel(hid_ref, enc_ref, w_hid_ref, w_enc_ref, b_ref, out_ref):
    hid = hid_ref[...]                                      # [1, H]
    enc = enc_ref[...]                                      # [S, H]
    # Fused cat([hid_rep, enc], -1) @ W_c  ==  hid @ W_c[:H]  (bcast over S)
    #                                        + enc @ W_c[H:]
    hid_proj = jnp.dot(hid, w_hid_ref[...],
                       preferred_element_type=jnp.float32)              # [1, H]
    enc_proj = jnp.dot(enc, w_enc_ref[...],
                       preferred_element_type=jnp.float32)              # [S, H]
    energy = jnp.tanh(enc_proj + hid_proj + b_ref[...])                 # [S, H]
    # Reference forward dots with `hidden` (self.v is unused there).
    scores = lax.dot_general(hid, energy, _SCORE_DN,
                             preferred_element_type=jnp.float32)        # [1, S]
    out_ref[...] = _softmax_lastdim(scores)


def luong_attention(method, hidden, encoder_outputs, attn_w=None, attn_b=None):
    """hidden: [B,1,H] f32, encoder_outputs: [B,S,H] f32.
       'general': attn_w [H,H], attn_b [1,H] (y = x @ W + b, i.e. torch W.T).
       'concat' : attn_w [2H,H], attn_b [1,H].
       Returns attention weights [B,1,S] f32."""
    B, one, H = hidden.shape
    assert one == 1
    _, S, He = encoder_outputs.shape
    assert He == H

    hid_spec = pl.BlockSpec((None, 1, H), lambda b: (b, 0, 0))
    enc_spec = pl.BlockSpec((None, S, H), lambda b: (b, 0, 0))
    out_spec = pl.BlockSpec((None, 1, S), lambda b: (b, 0, 0))
    w_spec = pl.BlockSpec((H, H), lambda b: (0, 0))     # weights resident
    b_spec = pl.BlockSpec((1, H), lambda b: (0, 0))
    cparams = pltpu.CompilerParams(dimension_semantics=("parallel",))
    out_shape = jax.ShapeDtypeStruct((B, 1, S), jnp.float32)

    if method == 'dot':
        return pl.pallas_call(
            _dot_kernel, out_shape=out_shape, grid=(B,),
            in_specs=[hid_spec, enc_spec], out_specs=out_spec,
            compiler_params=cparams,
        )(hidden, encoder_outputs)
    elif method == 'general':
        return pl.pallas_call(
            _general_kernel, out_shape=out_shape, grid=(B,),
            in_specs=[hid_spec, enc_spec, w_spec, b_spec], out_specs=out_spec,
            compiler_params=cparams,
        )(hidden, encoder_outputs, attn_w, attn_b)
    elif method == 'concat':
        # Split the [2H, H] weight in the wrapper to fuse concat + Linear.
        w_hid = attn_w[:H]
        w_enc = attn_w[H:]
        return pl.pallas_call(
            _concat_kernel, out_shape=out_shape, grid=(B,),
            in_specs=[hid_spec, enc_spec, w_spec, w_spec, b_spec],
            out_specs=out_spec,
            compiler_params=cparams,
        )(hidden, encoder_outputs, w_hid, w_enc, attn_b)
    else:
        raise ValueError(method, 'is not an appropriate attention method.')


def luong_attention_ref(method, hidden, encoder_outputs, attn_w=None, attn_b=None):
    """Pure-JAX reference mirroring the PyTorch forward."""
    if method == 'dot':
        energy = encoder_outputs
    elif method == 'general':
        energy = jnp.einsum('bsh,hk->bsk', encoder_outputs, attn_w) + attn_b
    elif method == 'concat':
        B, S, H = encoder_outputs.shape
        hid_rep = jnp.broadcast_to(hidden, (B, S, H))
        cat = jnp.concatenate([hid_rep, encoder_outputs], axis=-1)
        energy = jnp.tanh(jnp.einsum('bsf,fk->bsk', cat, attn_w) + attn_b)
    else:
        raise ValueError(method)
    scores = jnp.einsum('bih,bsh->bis', hidden, energy)[:, 0, :]    # [B, S]
    return jax.nn.softmax(scores, axis=1)[:, None, :]               # [B, 1, S]


if __name__ == "__main__":
    # Small synthetic config: batch=2, source length (windows)=16, hidden=32.
    B, S, H = 2, 16, 32

    key = jax.random.PRNGKey(0)
    k_hid, k_enc, k_wg, k_bg, k_wc, k_bc = jax.random.split(key, 6)

    hidden = jax.random.normal(k_hid, (B, 1, H), dtype=jnp.float32)
    encoder_outputs = jax.random.normal(k_enc, (B, S, H), dtype=jnp.float32)

    # Deterministic parameter init (shapes match nn.Linear, stored transposed
    # so y = x @ W + b).
    scale_g = 1.0 / jnp.sqrt(jnp.float32(H))
    scale_c = 1.0 / jnp.sqrt(jnp.float32(2 * H))
    w_general = jax.random.uniform(k_wg, (H, H), jnp.float32, -scale_g, scale_g)
    b_general = jax.random.uniform(k_bg, (1, H), jnp.float32, -scale_g, scale_g)
    w_concat = jax.random.uniform(k_wc, (2 * H, H), jnp.float32, -scale_c, scale_c)
    b_concat = jax.random.uniform(k_bc, (1, H), jnp.float32, -scale_c, scale_c)

    configs = {
        'dot': (None, None),
        'general': (w_general, b_general),
        'concat': (w_concat, b_concat),
    }

    for method, (w, b) in configs.items():
        out = luong_attention(method, hidden, encoder_outputs, w, b)
        out = jax.block_until_ready(out)
        ref = luong_attention_ref(method, hidden, encoder_outputs, w, b)
        assert out.shape == (B, 1, S), (method, out.shape)
        assert jnp.allclose(out, ref, atol=2e-5, rtol=2e-5), \
            f"mismatch vs reference for method={method}"
        # Attention weights must sum to 1 over the source axis.
        assert jnp.allclose(jnp.sum(out, axis=-1), 1.0, atol=1e-5), method

    print("KERNEL_OK")
</pallas_src>

<mosaic_0001>
module attributes {stable_mosaic.version = 11 : i64} {
  func.func @_dot_kernel(%arg0: i32, %arg1: memref<1x1x32xf32, #tpu.memory_space<vmem>>, %arg2: memref<1x16x32xf32, #tpu.memory_space<vmem>>, %arg3: memref<1x1x16xf32, #tpu.memory_space<vmem>>) attributes {dimension_semantics = [#tpu.dimension_semantics<parallel>], iteration_bounds = array<i64: 2>, scalar_prefetch = 0 : i64, scratch_operands = 0 : i64, tpu.core_type = #tpu.core_type<tc>, window_params = [{transform_indices = @transform_0, window_bounds = array<i64: 1, 1, 32>}, {transform_indices = @transform_1, window_bounds = array<i64: 1, 16, 32>}, {transform_indices = @transform_2, window_bounds = array<i64: 1, 1, 16>}]} {
    %c0 = arith.constant 0 : index
    %c0_0 = arith.constant 0 : index
    %c0_1 = arith.constant 0 : index
    %0 = vector.load %arg1[%c0, %c0_0, %c0_1] : memref<1x1x32xf32, #tpu.memory_space<vmem>>, vector<1x1x32xf32>
    %1 = vector.shape_cast %0 : vector<1x1x32xf32> to vector<1x32xf32>
    %c0_2 = arith.constant 0 : index
    %c0_3 = arith.constant 0 : index
    %c0_4 = arith.constant 0 : index
    %2 = vector.load %arg2[%c0_2, %c0_3, %c0_4] : memref<1x16x32xf32, #tpu.memory_space<vmem>>, vector<1x16x32xf32>
    %3 = vector.shape_cast %2 : vector<1x16x32xf32> to vector<16x32xf32>
    %cst = arith.constant dense<0.000000e+00> : vector<1x16xf32>
    %4 = tpu.matmul %1, %3, %cst {dimension_numbers = #tpu.dot_dimension_numbers<[1], [1], [0], [0], [0, 0, 1, 0], [], []>} : vector<1x32xf32>, vector<16x32xf32>, vector<1x16xf32> -> vector<1x16xf32>
    %cst_5 = arith.constant dense<0xFF800000> : vector<1xf32>
    %5 = vector.multi_reduction <maximumf>, %4, %cst_5 [1] : vector<1x16xf32> to vector<1xf32>
    %6 = vector.shape_cast %5 : vector<1xf32> to vector<1x1xf32>
    %7 = vector.broadcast %6 : vector<1x1xf32> to vector<1x16xf32>
    %8 = arith.subf %4, %7 : vector<1x16xf32>
    %9 = math.exp %8 : vector<1x16xf32>
    %cst_6 = arith.constant dense<0.000000e+00> : vector<1xf32>
    %10 = vector.multi_reduction <add>, %9, %cst_6 [1] : vector<1x16xf32> to vector<1xf32>
    %11 = vector.shape_cast %10 : vector<1xf32> to vector<1x1xf32>
    %12 = vector.broadcast %11 : vector<1x1xf32> to vector<1x16xf32>
    %13 = arith.divf %9, %12 : vector<1x16xf32>
    %c0_7 = arith.constant 0 : index
    %c0_8 = arith.constant 0 : index
    %c0_9 = arith.constant 0 : index
    %14 = vector.load %arg3[%c0_7, %c0_8, %c0_9] : memref<1x1x16xf32, #tpu.memory_space<vmem>>, vector<1x1x16xf32>
    %15 = vector.shape_cast %14 : vector<1x1x16xf32> to vector<1x16xf32>
    %16 = vector.shape_cast %13 : vector<1x16xf32> to vector<1x1x16xf32>
    tpu.vector_store %arg3[%c0_7, %c0_8, %c0_9], %16 {strides = array<i32>} : memref<1x1x16xf32, #tpu.memory_space<vmem>>, vector<1x1x16xf32>,
    return
  }
  func.func @transform_0(%arg0: i32) -> (i32, i32, i32) {
    %c0_i32 = arith.constant 0 : i32
    %c0_i32_0 = arith.constant 0 : i32
    %c0_i32_1 = arith.constant 0 : i32
    return %arg0, %c0_i32, %c0_i32_0 : i32, i32, i32
  }
  func.func @transform_1(%arg0: i32) -> (i32, i32, i32) {
    %c0_i32 = arith.constant 0 : i32
    %c0_i32_0 = arith.constant 0 : i32
    %c0_i32_1 = arith.constant 0 : i32
    return %arg0, %c0_i32, %c0_i32_0 : i32, i32, i32
  }
  func.func @transform_2(%arg0: i32) -> (i32, i32, i32) {
    %c0_i32 = arith.constant 0 : i32
    %c0_i32_0 = arith.constant 0 : i32
    %c0_i32_1 = arith.constant 0 : i32
    return %arg0, %c0_i32, %c0_i32_0 : i32, i32, i32
  }
}

</mosaic_0001>

<bundles_post_ra>
// kernel: tpu_custom_call.1
= control target key start
LH: loop header
LB: loop body
LE: loop exit
PB: predicated region body
PF: predicated region fallthrough
CT: control target
= control target key end

     0   :  { %7 = vsyncpa [#allocation3], 0  ;;  %s742_s0 = inlined_call_operand.hbm [shape: f32[2,1,32], index: 0, kind: input, shape index: {}]   ;;  %s743_s1 = inlined_call_operand.hbm [shape: f32[2,16,32], index: 1, kind: input, shape index: {}]   ;;  %s744_s2 = inlined_call_operand.hbm [shape: f32[2,1,16], index: 2, kind: output, shape index: {}]  }
   0x1   :  { %9 = vsyncpa [#allocation3 + $0x1], 0 }
   0x2   :  { %10 = vsyncpa [#allocation6], 0 }
   0x3   :  { %12 = vsyncpa [#allocation6 + $0x1], 0 }
   0x4   :  { %13 = vsyncpa [#allocation4], 0 }
   0x5   :  { %15 = vsyncpa [#allocation4 + $0x1], 0  ;;  %s575_s9 = smov 0   ;;  %s577_s10 = smov 0  }
   0x6   :  { %s579_s11 = smov 0   ;;  %s581_s12 = smov 0  }
   0x7 LB: > { %s596_s13 = sadd.s32 4294967295, %s556_s12   ;;  %s355_s14 = sadd.s32 4294967294, %s556_s12   ;;  %s556_s12 = sphi %s581_s12, %s755_s12   ;;  %s552_s11 = sphi %s579_s11, %s754_s11   ;;  %s548_s10 = sphi %s577_s10, %s753_s10   ;;  %s544_s9 = sphi %s575_s9, %s752_s9  }
   0x8   : > { %s600_s15 = sadd.s32 1, %s556_s12   ;;  %s28_s16 = sadd.s32 1, %s552_s11 }
   0x9   : > { %s25_s17 = ssub.s32 %s556_s12, %s600_s15  ;;  %p35_p0 = scmp.ne.s32.totalorder %s552_s11, %s548_s10 }
   0xa   : > { %p26_p1 = scmp.eq.s32.totalorder %s25_s17, 0  ;;  %p36_p2 = scmp.eq.s32.totalorder %s556_s12, 0 }
   0xb   : > { %p41_p3 = scmp.ne.s32.totalorder %s548_s10, %s544_s9  ;;  %p42_p4 = scmp.eq.s32.totalorder %s596_s13, 0 }
   0xc   : > { %s612_s18 = scalar_select %p26_p1, %s552_s11, %s28_s16  }
   0xd   : > { %p614_p5 = por %p36_p2, %p35_p0  ;;  %p618_p6 = por %p42_p4, %p41_p3 }
   0xe   : > { %p91_p7 = scmp.eq.s32.totalorder %s596_s13, 1  ;;  %p97_p8 = scmp.eq.s32.totalorder %s355_s14, 1 }
   0xf   : > { %p386_p10 = scmp.lt.s32.totalorder %s556_s12, 2  ;;  %s634_s23 = sand.u32 1, %s552_s11  }
  0x10   : > { %p625_p11 = por %p91_p7, %p35_p0  ;;  %p629_p12 = por %p97_p8, %p41_p3 }
  0x11   : > { %s123_s26 = scalar_lea.hbm %s742_s0, %s556_s12  ;;  %s120_s28 = scalar_lea.vmem [#allocation2], %s634_s23 }
  0x12   : > { %s125_s27 = sshll.u32 %s123_s26, 4  ;;  %s127_s29 = sshll.u32 %s120_s28, 4  ;;  %s126_s27 = int_to_ptr.hbm [resolvable:$true] %s125_s27  ;;  %s128_s29 = int_to_ptr.vmem [resolvable:$true] %s127_s29 }
  0x13   : > { %p643_p13 = pnand %p386_p10, %p614_p5  ;;  %p361_p0 = scmp.ge.s32.totalorder %s556_s12, 1 }
  0x14   : > { %p154_p1 = scmp.lt.s32.totalorder %s556_s12, 3  ;;  %s358_s3 = sshll.u32 %s634_s23, 4 }
  0x15   : > { %s118_s4 = scalar_lea.sflag [#allocation3], %s634_s23  ;;  %s426_s5 = sshra.s32 %s126_s27, 4  ;;  %s427_s5 = int_to_ptr.hbm [resolvable:$true] %s426_s5 }
  0x16   : > { %s428_s6 = scalar_lea.hbm %s427_s5, 1  ;;  %p430_p3 = pneg %p643_p13 }
  0x17   : > { %p429_p2 = scmp.ne.s32.totalorder %s427_s5, %s428_s6  ;;  %s433_s14 = scalar_lea.hbm %s742_s0, 2 }
  0x18   : > { %p434_p5 = scmp.lt.s32.totalorder %s427_s5, %s742_s0  ;;  %p435_p8 = scmp.lt.s32.totalorder %s433_s14, %s428_s6 }
  0x19   : > { %p431_p4 = pnand %p430_p3, %p429_p2 }
  0x1a   : > { %p436_p10 = por %p435_p8, %p434_p5 }
  0x1b   : > { %p432_p7 = pneg %p431_p4 }
  0x1d   : > { %p437_p9 = pnand %p436_p10, %p432_p7 }
  0x1f   : > { %440 = shalt.err (!%p437_p9)
}
  0x20   : > { %378 = dma.hbm_to_vmem [thread:$0]  (!%p643_p13), %s126_s27, 16, %s128_s29, %s118_s4  }
  0x21   : > { %p668_p2 = pnand %p361_p0, %p154_p1  ;;  %s368_s24 = sshll.u32 %s556_s12, 4 }
  0x22   : > { %s138_s25 = scalar_lea.vmem [#allocation5], %s358_s3  ;;  %s143_s6 = scalar_lea.hbm %s743_s1, %s368_s24 }
  0x23   : > { %s146_s26 = sshll.u32 %s138_s25, 4  ;;  %s144_s7 = sshll.u32 %s143_s6, 4  ;;  %s147_s26 = int_to_ptr.vmem [resolvable:$true] %s146_s26  ;;  %s145_s7 = int_to_ptr.hbm [resolvable:$true] %s144_s7 }
  0x24   : > { %s135_s8 = scalar_lea.sflag [#allocation6], %s634_s23  ;;  %s456_s14 = sshra.s32 %s145_s7, 4  ;;  %s457_s14 = int_to_ptr.hbm [resolvable:$true] %s456_s14 }
  0x25   : > { %s458_s27 = scalar_lea.hbm %s457_s14, 16  ;;  %s463_s3 = scalar_lea.hbm %s743_s1, 32 }
  0x26   : > { %p459_p9 = scmp.ne.s32.totalorder %s457_s14, %s458_s27  ;;  %p464_p4 = scmp.lt.s32.totalorder %s457_s14, %s743_s1 }
  0x27   : > { %p465_p7 = scmp.lt.s32.totalorder %s463_s3, %s458_s27 }
  0x28   : > { %p461_p0 = pnand %p459_p9, %p430_p3 }
  0x29   : > { %p466_p5 = por %p465_p7, %p464_p4 }
  0x2a   : > { %p462_p1 = pneg %p461_p0 }
  0x2c   : > { %p467_p8 = pnand %p466_p5, %p462_p1 }
  0x2e   : > { %470 = shalt.err (!%p467_p8)
}
  0x2f   : > { %s558_s23 = smov 128   ;;  %s559_s24 = smov 8  }
  0x30   : > { %381 = dma.hbm_to_vmem [thread:$0]  (!%p643_p13), %s145_s7, 256, %s147_s26, %s135_s8, %s558_s23, %s558_s23, %s559_s24  }
  0x31   : > { %158 = sbr.rel (%p668_p2) target bundleno = 459 (0x1cb), region = 28  ;;  %s691_s25 = sand.u32 (!%p668_p2), 1, %s548_s10  }
  0x32   : > { %s161_s28 = scalar_lea.sflag (!%p668_p2), [#allocation3], %s691_s25  ;;  %s163_s5 = scalar_lea.vmem (!%p668_p2), [#allocation2], %s691_s25 }
  0x36   : > { %531 = dma.done.wait (%p618_p6), %s161_s28, 16  }
  0x37   : > { %533 = vsyncadd (%p618_p6), %s161_s28, 4294967280  ;;  %s362_s30 = sshll.u32 %s691_s25, 4  ;;  %s170_s26 = scalar_lea.sflag [#allocation6], %s691_s25 }
  0x38   : > { %s173_s19 = scalar_lea.vmem [#allocation5], %s362_s30 }
  0x39   : > { %535 = dma.done.wait (%p618_p6), %s170_s26, 256  }
  0x3a   : > { %537 = vsyncadd (%p618_p6), %s170_s26, 4294967040  ;;  %vm201_vm0 = vcmask 261120   ;;  %v200_v0 = vld [vmem:[%s173_s19 + $0x8] sm:$0xff]  ;;  %v199_v1 = vld [vmem:[%s173_s19] sm:$0xff]  ;;  %vm231_vm1 = vcmask 122880   ;;  %s266_s7 = scalar_lea.hbm %s744_s2, %s596_s13  ;;  %s197_s8 = scalar_lea.vmem [#allocation7], %s691_s25 }
  0x3b   : > { %363 = vmatpush.xpose.msk.msra.mxu0 %vm201_vm0, %v200_v0  ;;  %v198_v2 = vld [vmem:[%s163_s5] sm:$0x1]  ;;  %s268_s14 = sshll.u32 %s197_s8, 4  ;;  %s270_s27 = sshll.u32 %s266_s7, 4  ;;  %s269_s14 = int_to_ptr.vmem [resolvable:$true] %s268_s14  ;;  %s271_s27 = int_to_ptr.hbm [resolvable:$true] %s270_s27 }
  0x3c   : > { %s258_s29 = scalar_lea.sflag [#allocation4], %s691_s25  ;;  %s500_s4 = sshra.s32 %s271_s27, 4  ;;  %s501_s4 = int_to_ptr.hbm [resolvable:$true] %s500_s4 }
  0x3d   : > { %s502_s13 = scalar_lea.hbm %s501_s4, 1  ;;  %s506_s17 = scalar_lea.hbm %s744_s2, 2 }
  0x3e   : > { %p503_p6 = scmp.ne.s32.totalorder %s501_s4, %s502_s13  ;;  %p507_p10 = scmp.lt.s32.totalorder %s501_s4, %s744_s2 }
  0x3f   : > { %364 = vmatpush.xpose.msk.msra.mxu0 %vm201_vm0, %v199_v1  ;;  %p508_p2 = scmp.lt.s32.totalorder %s506_s17, %s502_s13 }
  0x40   : > { %p504_p13 = pnand %p503_p6, %p625_p11 }
  0x41   : > { %p509_p9 = por %p508_p2, %p507_p10 }
  0x42   : > { %365 = vmatmul.msk.f32.vlgmr.msra.gmra.mxu0 %vm201_vm0, %v198_v2  ;;  %p505_p3 = pneg %p504_p13 }
  0x44   : > { %p510_p0 = pnand %p509_p9, %p505_p3 }
  0xbf   : > { %v228_v3 = vpop.f32.mrf.mxu0 }
  0xc0   : > { %v232_v4 = vsel %vm231_vm1, %v228_v3, -inf }
  0xc1   : > { %233 = vmax.xlane.f32.xlu0 %v232_v4 }
 0x134   : > { %v234_v5 = vpop.xlane.xlu0 %233 }
 0x135   : > { %v235_v6 = vsub.f32 %v228_v3, %v234_v5 }
 0x137   : > { %v236_v7 = vmul.f32 1.442695, %v235_v6 }
 0x139   : > { %422 = vpow2.f32 %v236_v7 }
 0x13f   : > { %v423_v8 = vpop.eup %422 }
 0x140   : > { %v238_v9 = vsel %vm231_vm1, %v423_v8, 0.0 }
 0x141   : > { %239 = vadd.xlane.f32.xlu0 %v238_v9 }
 0x1b4   : > { %v240_v10 = vpop.xlane.xlu0 %239 }
 0x1b5   : > { %424 = vrcp.f32 %v240_v10  ;;  %v252_v14 = vand.u32 2147483648, %v240_v10  ;;  %v250_v16 = vand.u32 2147483647, %v240_v10  ;;  %vm246_vm3 = vweird.f32 %v240_v10 }
 0x1b7   : > { %v253_v18 = vor.u32 1.1754944e-38, %v252_v14  ;;  %vm251_vm5 = vcmp.eq.f32.partialorder %v250_v16, 8.507059e+37 }
 0x1bb   : > { %v425_v11 = vpop.eup %424 }
 0x1bc   : > { %v242_v12 = vmul.f32 %v425_v11, %v240_v10  ;;  %vm247_vm2 = vweird.f32 %v425_v11 }
 0x1bd   : > { %vm248_vm4 = vmor %vm246_vm3, %vm247_vm2 }
 0x1be   : > { %v243_v13 = vsub.f32 1.0, %v242_v12 }
 0x1c0   : > { %v244_v15 = vmul.f32 %v425_v11, %v243_v13 }
 0x1c2   : > { %v245_v17 = vadd.f32 %v425_v11, %v244_v15 }
 0x1c4   : > { %v249_v19 = vsel %vm248_vm4, %v425_v11, %v245_v17 }
 0x1c5   : > { %v254_v20 = vsel %vm251_vm5, %v253_v18, %v249_v19 }
 0x1c6   : > { %v255_v21 = vmul.f32 %v423_v8, %v254_v20 }
 0x1c8   : > { %256 = vst.msk [vmem:[%s197_s8] sm:$0x1] %vm231_vm1, %v255_v21 }
 0x1c9   : > { %513 = shalt.err (!%p510_p0)
}
 0x1ca   : > { %373 = dma.vmem_to_hbm [thread:$0]  (%p625_p11), %s269_s14, 16, %s271_s27, %s258_s29  }
 0x1cb PF: > { %s282_s25 = sand.u32 1, %s544_s9   ;;  %p751_p1 = scmp.ge.s32.totalorder %s556_s12, 2 }
 0x1cc   : > { %s283_s28 = scalar_lea.sflag [#allocation4], %s282_s25 }
 0x1cd   : > { %p383_p4 = pnand %p751_p1, %p629_p12 }
 0x1cf   : > { %p384_p7 = pneg %p383_p4 }
 0x1d1   : > { %539 = dma.done.wait (%p384_p7), %s283_s28, 16  }
 0x1d2   : > { %541 = vsyncadd (%p384_p7), %s283_s28, 4294967280  ;;  %p18_p5 = scmp.ge.s32.totalorder %s600_s15, 4   ;;  %s752_s9 = smov %s548_s10 }
 0x1d3   : > { %s753_s10 = smov %s552_s11  ;;  %s754_s11 = smov %s612_s18 }
 0x1d4   : > { %s755_s12 = smov %s600_s15  ;;  %20 = sbr.rel (!%p18_p5) target bundleno = 7 (0x7), region = 86 }
 0x1d9   :  { %288 = vsyncpa [#allocation3], 1 }
 0x1da   :  { %290 = vsyncpa [#allocation3 + $0x1], 1 }
 0x1db   :  { %291 = vsyncpa [#allocation6], 1 }
 0x1dc   :  { %293 = vsyncpa [#allocation6 + $0x1], 1 }
 0x1dd   :  { %294 = vsyncpa [#allocation4], 1 }
 0x1de   :  { %296 = vsyncpa [#allocation4 + $0x1], 1 }

</bundles_post_ra>
